<compile_context>
chip_gen: v7x
topology: tpu7x:2x2x1
jax: 0.10.0
libtpu: 0.0.40
codegen_flags: <defaults>
</compile_context>

<pallas_src>
import jax
import jax.numpy as jnp
from jax.experimental import pallas as pl
from jax.experimental.pallas import tpu as pltpu

INPUT_SIZE = 64           # flattened board features
HIDDEN_SIZE = 32          # logical hidden size of the PyTorch module
ACTION_SPACE_SIZE = 128   # lane-dense output width
NEG_INF = -1e9


def _round_up(n, m):
    return (n + m - 1) // m * m


def chessnet_kernel(x_ref, mask_ref, w1_ref, b1_ref, w2_ref, b2_ref, out_ref):
    # fc1: cast x to bf16 in-kernel (VPU, free), MXU matmul with f32 accumulation.
    x = x_ref[...].astype(jnp.bfloat16)
    h = jnp.dot(x, w1_ref[...], preferred_element_type=jnp.float32)
    h = jnp.maximum(h + b1_ref[...], 0.0)

    # fc2: cast activation to bf16 for the MXU, accumulate in f32.
    logits = jnp.dot(h.astype(jnp.bfloat16), w2_ref[...],
                     preferred_element_type=jnp.float32)
    logits = logits + b2_ref[...]

    # MaskLayer: keep legal-action logits, suppress illegal ones (compare in native dtype).
    out_ref[...] = jnp.where(mask_ref[...] != 0, logits, NEG_INF).astype(out_ref.dtype)


def prepare_params(w1, b1, w2, b2):
    """One-time weight prep (hoisted out of the per-call path): pad hidden dim to a full
    128-lane width and cast MXU operands to bf16. Zero pads are inert:
    relu(0 + 0) = 0 flows through zero rows of w2 and contributes nothing."""
    I, H = w1.shape
    A = w2.shape[1]
    Hp = _round_up(H, 128)
    w1p = jnp.zeros((I, Hp), jnp.bfloat16).at[:, :H].set(w1.astype(jnp.bfloat16))
    b1p = jnp.zeros((1, Hp), jnp.float32).at[:, :H].set(b1.reshape(1, H).astype(jnp.float32))
    w2p = jnp.zeros((Hp, A), jnp.bfloat16).at[:H, :].set(w2.astype(jnp.bfloat16))
    b2p = b2.reshape(1, A).astype(jnp.float32)
    return w1p, b1p, w2p, b2p


def chessnet_forward(x, mask, params, *, tile_b=4096, out_dtype=jnp.float32,
                     min_grid_steps=2):
    """x:(B,I) float, mask:(B,A) any numeric (nonzero = legal), params from prepare_params().
    Returns (B, A) masked logits in out_dtype (f32 default; bf16 halves output HBM bytes)."""
    w1p, b1p, w2p, b2p = params
    B, I = x.shape
    Hp = w1p.shape[1]
    A = w2p.shape[1]

    # --- Batch tile: as large as tile_b allows (amortize per-step overhead), but keep at
    #     least `min_grid_steps` grid steps so multi-TC chips (v7x) can shard the batch,
    #     and never much larger than the batch itself. Multiple of 8 (f32 sublanes). ---
    TB = min(tile_b, _round_up(pl.cdiv(B, min_grid_steps), 256))
    TB = min(TB, _round_up(B, 8))
    TB = max(8, _round_up(TB, 8))
    grid = (pl.cdiv(B, TB),)   # ragged last block handled by Pallas; no batch padding.

    flops = 2 * B * (I * Hp + Hp * A)
    out_itemsize = jnp.dtype(out_dtype).itemsize
    bytes_accessed = (B * I * x.dtype.itemsize + B * A * mask.dtype.itemsize
                      + B * A * out_itemsize
                      + w1p.size * 2 + w2p.size * 2 + b1p.size * 4 + b2p.size * 4)

    # Scoped-VMEM budget: double-buffered streaming blocks + resident weights. Only raise
    # the limit when a huge tile would exceed the smallest default (16 MiB on v5e).
    block_bytes = TB * (I * x.dtype.itemsize + A * mask.dtype.itemsize + A * out_itemsize)
    weight_bytes = int(w1p.size * 2 + w2p.size * 2 + b1p.size * 4 + b2p.size * 4)
    est_vmem = 2 * block_bytes + 2 * weight_bytes + (2 << 20)
    compiler_kwargs = {"dimension_semantics": ("parallel",)}
    if est_vmem > (16 << 20):
        compiler_kwargs["vmem_limit_bytes"] = int(max(est_vmem, 32 << 20))

    out = pl.pallas_call(
        chessnet_kernel,
        out_shape=jax.ShapeDtypeStruct((B, A), out_dtype),
        grid=grid,
        in_specs=[
            pl.BlockSpec((TB, I), lambda i: (i, 0)),    # x: streams per batch tile
            pl.BlockSpec((TB, A), lambda i: (i, 0)),    # mask: streams per batch tile
            pl.BlockSpec((I, Hp), lambda i: (0, 0)),    # w1: resident (never re-DMA'd)
            pl.BlockSpec((1, Hp), lambda i: (0, 0)),    # b1: resident
            pl.BlockSpec((Hp, A), lambda i: (0, 0)),    # w2: resident
            pl.BlockSpec((1, A), lambda i: (0, 0)),     # b2: resident
        ],
        out_specs=pl.BlockSpec((TB, A), lambda i: (i, 0)),
        compiler_params=pltpu.CompilerParams(**compiler_kwargs),
        cost_estimate=pl.CostEstimate(
            flops=flops, transcendentals=0, bytes_accessed=bytes_accessed),
    )(x, mask, w1p, b1p, w2p, b2p)

    return out


def init_params(key):
    """Deterministic init mimicking PyTorch nn.Linear (uniform +/- 1/sqrt(fan_in))."""
    k1, k2, k3, k4 = jax.random.split(key, 4)
    bound1 = 1.0 / jnp.sqrt(INPUT_SIZE)
    bound2 = 1.0 / jnp.sqrt(HIDDEN_SIZE)
    w1 = jax.random.uniform(k1, (INPUT_SIZE, HIDDEN_SIZE), jnp.float32, -bound1, bound1)
    b1 = jax.random.uniform(k2, (1, HIDDEN_SIZE), jnp.float32, -bound1, bound1)
    w2 = jax.random.uniform(k3, (HIDDEN_SIZE, ACTION_SPACE_SIZE), jnp.float32, -bound2, bound2)
    b2 = jax.random.uniform(k4, (1, ACTION_SPACE_SIZE), jnp.float32, -bound2, bound2)
    return w1, b1, w2, b2


def reference_forward(x, mask, w1, b1, w2, b2, *, matmul_dtype=jnp.bfloat16):
    """Pure-JAX reference. matmul_dtype=bf16 mirrors the kernel's MXU math;
    matmul_dtype=f32 gives the exact PyTorch-equivalent reference."""
    h = jnp.dot(x.astype(matmul_dtype), w1.astype(matmul_dtype),
                preferred_element_type=jnp.float32) + b1
    h = jnp.maximum(h, 0.0)
    logits = jnp.dot(h.astype(matmul_dtype), w2.astype(matmul_dtype),
                     preferred_element_type=jnp.float32) + b2
    return jnp.where(mask != 0, logits, NEG_INF)


if __name__ == "__main__":
    key = jax.random.PRNGKey(0)
    kx, km, kp, kx2, km2 = jax.random.split(key, 5)

    w1, b1, w2, b2 = init_params(kp)
    params = prepare_params(w1, b1, w2, b2)   # hoisted: done once, reused across calls

    # 1) Small batch (single, partially-filled block).
    B = 2
    x = jax.random.normal(kx, (B, INPUT_SIZE), jnp.float32)
    mask = (jax.random.uniform(km, (B, ACTION_SPACE_SIZE)) > 0.5).astype(jnp.float32)
    out = jax.block_until_ready(chessnet_forward(x, mask, params))
    ref_bf16 = reference_forward(x, mask, w1, b1, w2, b2)
    ref_f32 = reference_forward(x, mask, w1, b1, w2, b2, matmul_dtype=jnp.float32)
    assert out.shape == (B, ACTION_SPACE_SIZE) and out.dtype == jnp.float32
    assert jnp.allclose(out, ref_bf16, atol=1e-2, rtol=1e-2), "mismatch vs bf16 reference (B=2)"
    assert jnp.allclose(out, ref_f32, atol=5e-2, rtol=2e-2), "mismatch vs f32 reference (B=2)"

    # 2) Multi-step grid with a ragged last block (resident weights + unpadded batch path).
    B2 = 40
    x2 = jax.random.normal(kx2, (B2, INPUT_SIZE), jnp.float32)
    mask2 = (jax.random.uniform(km2, (B2, ACTION_SPACE_SIZE)) > 0.5).astype(jnp.float32)
    out2 = jax.block_until_ready(chessnet_forward(x2, mask2, params, tile_b=32))
    ref2_bf16 = reference_forward(x2, mask2, w1, b1, w2, b2)
    ref2_f32 = reference_forward(x2, mask2, w1, b1, w2, b2, matmul_dtype=jnp.float32)
    assert out2.shape == (B2, ACTION_SPACE_SIZE)
    assert jnp.allclose(out2, ref2_bf16, atol=1e-2, rtol=1e-2), "mismatch vs bf16 reference (B=40)"
    assert jnp.allclose(out2, ref2_f32, atol=5e-2, rtol=2e-2), "mismatch vs f32 reference (B=40)"

    # 3) Bandwidth-optimized bf16 output path (rtol covers -1e9's bf16 rounding on masked slots).
    out3 = jax.block_until_ready(
        chessnet_forward(x2, mask2, params, tile_b=32, out_dtype=jnp.bfloat16))
    assert out3.dtype == jnp.bfloat16
    assert jnp.allclose(out3.astype(jnp.float32), ref2_bf16, atol=5e-2, rtol=2e-2), \
        "mismatch vs reference (bf16 output)"

    print("KERNEL_OK")
</pallas_src>

<mosaic_0001>
module attributes {stable_mosaic.version = 11 : i64} {
  func.func @chessnet_kernel(%arg0: i32, %arg1: memref<8x64xf32, #tpu.memory_space<vmem>>, %arg2: memref<8x128xf32, #tpu.memory_space<vmem>>, %arg3: memref<64x128xbf16, #tpu.memory_space<vmem>>, %arg4: memref<1x128xf32, #tpu.memory_space<vmem>>, %arg5: memref<128x128xbf16, #tpu.memory_space<vmem>>, %arg6: memref<1x128xf32, #tpu.memory_space<vmem>>, %arg7: memref<8x128xf32, #tpu.memory_space<vmem>>) attributes {dimension_semantics = [#tpu.dimension_semantics<parallel>], iteration_bounds = array<i64: 1>, scalar_prefetch = 0 : i64, scratch_operands = 0 : i64, tpu.core_type = #tpu.core_type<tc>, window_params = [{transform_indices = @transform_0, window_bounds = array<i64: 8, 64>}, {transform_indices = @transform_1, window_bounds = array<i64: 8, 128>}, {pipeline_mode = #tpu.pipeline_mode<synchronous>, transform_indices = @transform_2, window_bounds = array<i64: 64, 128>}, {pipeline_mode = #tpu.pipeline_mode<synchronous>, transform_indices = @transform_3, window_bounds = array<i64: 1, 128>}, {pipeline_mode = #tpu.pipeline_mode<synchronous>, transform_indices = @transform_4, window_bounds = array<i64: 128, 128>}, {pipeline_mode = #tpu.pipeline_mode<synchronous>, transform_indices = @transform_5, window_bounds = array<i64: 1, 128>}, {transform_indices = @transform_6, window_bounds = array<i64: 8, 128>}]} {
    %c0 = arith.constant 0 : index
    %c0_0 = arith.constant 0 : index
    %0 = vector.load %arg1[%c0, %c0_0] : memref<8x64xf32, #tpu.memory_space<vmem>>, vector<8x64xf32>
    %1 = arith.truncf %0 : vector<8x64xf32> to vector<8x64xbf16>
    %c0_1 = arith.constant 0 : index
    %c0_2 = arith.constant 0 : index
    %2 = vector.load %arg3[%c0_1, %c0_2] : memref<64x128xbf16, #tpu.memory_space<vmem>>, vector<64x128xbf16>
    %cst = arith.constant dense<0.000000e+00> : vector<8x128xf32>
    %3 = tpu.matmul %1, %2, %cst {dimension_numbers = #tpu.dot_dimension_numbers<[1], [0], [0], [1], [0, 0, 1, 1], [], []>} : vector<8x64xbf16>, vector<64x128xbf16>, vector<8x128xf32> -> vector<8x128xf32>
    %c0_3 = arith.constant 0 : index
    %c0_4 = arith.constant 0 : index
    %4 = vector.load %arg4[%c0_3, %c0_4] : memref<1x128xf32, #tpu.memory_space<vmem>>, vector<1x128xf32>
    %5 = vector.broadcast %4 : vector<1x128xf32> to vector<8x128xf32>
    %6 = arith.addf %3, %5 : vector<8x128xf32>
    %cst_5 = arith.constant 0.000000e+00 : f32
    %7 = vector.broadcast %cst_5 : f32 to vector<8x128xf32>
    %8 = arith.maximumf %6, %7 : vector<8x128xf32>
    %9 = arith.truncf %8 : vector<8x128xf32> to vector<8x128xbf16>
    %c0_6 = arith.constant 0 : index
    %c0_7 = arith.constant 0 : index
    %10 = vector.load %arg5[%c0_6, %c0_7] : memref<128x128xbf16, #tpu.memory_space<vmem>>, vector<128x128xbf16>
    %cst_8 = arith.constant dense<0.000000e+00> : vector<8x128xf32>
    %11 = tpu.matmul %9, %10, %cst_8 {dimension_numbers = #tpu.dot_dimension_numbers<[1], [0], [0], [1], [0, 0, 1, 1], [], []>} : vector<8x128xbf16>, vector<128x128xbf16>, vector<8x128xf32> -> vector<8x128xf32>
    %c0_9 = arith.constant 0 : index
    %c0_10 = arith.constant 0 : index
    %12 = vector.load %arg6[%c0_9, %c0_10] : memref<1x128xf32, #tpu.memory_space<vmem>>, vector<1x128xf32>
    %13 = vector.broadcast %12 : vector<1x128xf32> to vector<8x128xf32>
    %14 = arith.addf %11, %13 : vector<8x128xf32>
    %c0_11 = arith.constant 0 : index
    %c0_12 = arith.constant 0 : index
    %15 = vector.load %arg2[%c0_11, %c0_12] : memref<8x128xf32, #tpu.memory_space<vmem>>, vector<8x128xf32>
    %cst_13 = arith.constant 0.000000e+00 : f32
    %16 = vector.broadcast %cst_13 : f32 to vector<8x128xf32>
    %17 = arith.cmpf one, %15, %16 : vector<8x128xf32>
    %cst_14 = arith.constant -1.000000e+09 : f32
    %18 = vector.broadcast %cst_14 : f32 to vector<8x128xf32>
    %19 = arith.select %17, %14, %18 : vector<8x128xi1>, vector<8x128xf32>
    %c0_15 = arith.constant 0 : index
    %c0_16 = arith.constant 0 : index
    %20 = vector.load %arg7[%c0_15, %c0_16] : memref<8x128xf32, #tpu.memory_space<vmem>>, vector<8x128xf32>
    tpu.vector_store %arg7[%c0_15, %c0_16], %19 {strides = array<i32>} : memref<8x128xf32, #tpu.memory_space<vmem>>, vector<8x128xf32>,
    return
  }
  func.func @transform_0(%arg0: i32) -> (i32, i32) {
    %c0_i32 = arith.constant 0 : i32
    %c0_i32_0 = arith.constant 0 : i32
    return %arg0, %c0_i32 : i32, i32
  }
  func.func @transform_1(%arg0: i32) -> (i32, i32) {
    %c0_i32 = arith.constant 0 : i32
    %c0_i32_0 = arith.constant 0 : i32
    return %arg0, %c0_i32 : i32, i32
  }
  func.func @transform_2(%arg0: i32) -> (i32, i32) {
    %c0_i32 = arith.constant 0 : i32
    %c0_i32_0 = arith.constant 0 : i32
    %c0_i32_1 = arith.constant 0 : i32
    return %c0_i32, %c0_i32_0 : i32, i32
  }
  func.func @transform_3(%arg0: i32) -> (i32, i32) {
    %c0_i32 = arith.constant 0 : i32
    %c0_i32_0 = arith.constant 0 : i32
    %c0_i32_1 = arith.constant 0 : i32
    return %c0_i32, %c0_i32_0 : i32, i32
  }
  func.func @transform_4(%arg0: i32) -> (i32, i32) {
    %c0_i32 = arith.constant 0 : i32
    %c0_i32_0 = arith.constant 0 : i32
    %c0_i32_1 = arith.constant 0 : i32
    return %c0_i32, %c0_i32_0 : i32, i32
  }
  func.func @transform_5(%arg0: i32) -> (i32, i32) {
    %c0_i32 = arith.constant 0 : i32
    %c0_i32_0 = arith.constant 0 : i32
    %c0_i32_1 = arith.constant 0 : i32
    return %c0_i32, %c0_i32_0 : i32, i32
  }
  func.func @transform_6(%arg0: i32) -> (i32, i32) {
    %c0_i32 = arith.constant 0 : i32
    %c0_i32_0 = arith.constant 0 : i32
    return %arg0, %c0_i32 : i32, i32
  }
}

</mosaic_0001>

<bundles_post_ra>
// kernel: tpu_custom_call.1
= control target key start
LH: loop header
LB: loop body
LE: loop exit
PB: predicated region body
PF: predicated region fallthrough
CT: control target
= control target key end

     0   :  { %11 = vsyncpa [#allocation3], 0  ;;  %s577_s0 = inlined_call_operand.hbm [shape: f32[2,64], index: 0, kind: input, shape index: {}]   ;;  %s578_s1 = inlined_call_operand.vmem [shape: f32[2,128], index: 1, kind: input, shape index: {}]   ;;  %s579_s2 = inlined_call_operand.hbm [shape: bf16[64,128], index: 2, kind: input, shape index: {}]   ;;  %s580_s3 = inlined_call_operand.vmem [shape: f32[1,128], index: 3, kind: input, shape index: {}]   ;;  %s581_s4 = inlined_call_operand.hbm [shape: bf16[128,128], index: 4, kind: input, shape index: {}]   ;;  %s582_s5 = inlined_call_operand.vmem [shape: f32[1,128], index: 5, kind: input, shape index: {}]   ;;  %s583_s6 = inlined_call_operand.hbm [shape: f32[2,128], index: 6, kind: output, shape index: {}]  }
   0x1   :  { %12 = vsyncpa [#allocation6], 0 }
   0x2   :  { %13 = vsyncpa [#allocation4], 0 }
   0x3   :  { %18 = vsyncadd [#allocation3], 96  ;;  %s463_s21 = smov [#allocation5]   ;;  %s369_s25 = scalar_lea.hbm %s579_s2, 512 }
   0x4   :  { %s33_s22 = sshll.u32 %s463_s21, 4  ;;  %p370_p0 = scmp.ne.s32.totalorder %s579_s2, %s369_s25  ;;  %s34_s22 = int_to_ptr.vmem [resolvable:$true] %s33_s22 }
   0x5   :  { %p373_p1 = scmp.lt.u32.totalorder %s369_s25, %s579_s2 }
   0x7   :  { %p375_p2 = pnand %p373_p1, %p370_p0 }
   0x9   :  { %378 = shalt.err (!%p375_p2)
}
   0xa   :  { %s379_s30 = scalar_lea.vmem %s34_s22, 512  ;;  %p384_p4 = scmp.lt.s32.totalorder %s34_s22, %s34_s22 }
   0xb   :  { %p380_p3 = scmp.ne.s32.totalorder %s34_s22, %s379_s30  ;;  %p385_p5 = scmp.lt.s32.totalorder %s379_s30, %s379_s30 }
   0xd   :  { %p386_p6 = por %p385_p5, %p384_p4 }
   0xf   :  { %p387_p7 = pnand %p386_p6, %p380_p3 }
  0x11   :  { %390 = shalt.err (!%p387_p7)
}
  0x12   :  { %s464_s7 = smov 64   ;;  %s465_s8 = smov 4  }
  0x13   :  { %39 = dma.hbm_to_vmem [thread:$0]  %s579_s2, 512, %s34_s22, [#allocation6], %s464_s7, %s464_s7, %s465_s8  }
  0x14   :  { %s466_s11 = smov [#allocation2]   ;;  %s391_s15 = scalar_lea.hbm %s577_s0, 32 }
  0x15   :  { %s19_s12 = sshll.u32 %s466_s11, 4  ;;  %p392_p8 = scmp.ne.s32.totalorder %s577_s0, %s391_s15  ;;  %s20_s12 = int_to_ptr.vmem [resolvable:$true] %s19_s12 }
  0x16   :  { %p395_p9 = scmp.lt.u32.totalorder %s391_s15, %s577_s0 }
  0x18   :  { %p397_p10 = pnand %p395_p9, %p392_p8 }
  0x1a   :  { %400 = shalt.err (!%p397_p10)
}
  0x1b   :  { %s401_s20 = scalar_lea.vmem %s20_s12, 32  ;;  %s405_s2 = scalar_lea.vmem %s20_s12, 128 }
  0x1c   :  { %p402_p11 = scmp.ne.s32.totalorder %s20_s12, %s401_s20  ;;  %p406_p12 = scmp.lt.s32.totalorder %s20_s12, %s20_s12 }
  0x1d   :  { %p407_p13 = scmp.lt.s32.totalorder %s405_s2, %s401_s20 }
  0x1f   :  { %p408_p0 = por %p407_p13, %p406_p12 }
  0x21   :  { %p409_p1 = pnand %p408_p0, %p402_p11 }
  0x23   :  { %412 = shalt.err (!%p409_p1)
}
  0x24   :  { %s467_s21 = smov 32   ;;  %s468_s22 = smov 2  }
  0x25   :  { %25 = dma.hbm_to_vmem [thread:$0]  %s577_s0, 32, %s20_s12, [#allocation3], %s467_s21, %s467_s21, %s468_s22  }
  0x26   :  { %s469_s25 = smov [#allocation7]   ;;  %s413_s29 = scalar_lea.hbm %s581_s4, 1024 }
  0x27   :  { %s47_s26 = sshll.u32 %s469_s25, 4  ;;  %p414_p2 = scmp.ne.s32.totalorder %s581_s4, %s413_s29  ;;  %s48_s26 = int_to_ptr.vmem [resolvable:$true] %s47_s26 }
  0x28   :  { %p417_p3 = scmp.lt.u32.totalorder %s413_s29, %s581_s4 }
  0x2a   :  { %p419_p4 = pnand %p417_p3, %p414_p2 }
  0x2c   :  { %422 = shalt.err (!%p419_p4)
}
  0x2d   :  { %s423_s13 = scalar_lea.vmem %s48_s26, 1024  ;;  %p428_p6 = scmp.lt.s32.totalorder %s48_s26, %s48_s26 }
  0x2e   :  { %p424_p5 = scmp.ne.s32.totalorder %s48_s26, %s423_s13  ;;  %p429_p7 = scmp.lt.s32.totalorder %s423_s13, %s423_s13 }
  0x30   :  { %p430_p8 = por %p429_p7, %p428_p6 }
  0x32   :  { %p431_p9 = pnand %p430_p8, %p424_p5 }
  0x34   :  { %434 = shalt.err (!%p431_p9)
}
  0x35   :  { %53 = dma.hbm_to_vmem [thread:$0]  %s581_s4, 1024, %s48_s26, [#allocation6], %s464_s7, %s464_s7, %s465_s8  }
  0x36   :  { %457 = dma.done.wait [#allocation3], 128  }
  0x37   :  { %458 = vsyncadd [#allocation3], 4294967168 }
  0x38   :  { %459 = dma.done.wait [#allocation6], 1536  }
  0x39   :  { %460 = vsyncadd [#allocation6], 4294965760  ;;  %v470_v0 = vmov 0.0   ;;  %vm471_vm0 = vmmov 0   ;;  %v357_v1 = vld [vmem:[#allocation5] sm:$0xff]   ;;  %v358_v2 = vld [vmem:[#allocation5 + $0x8] sm:$0xff]  }
  0x3a   :  { %315 = vmatprep.subr.bf16.mxu0 %v470_v0  ;;  %323 = vmatprep.mubr.msk.bf16.mxu0 %vm471_vm0, %v470_v0  ;;  %v361_v3 = vld [vmem:[#allocation7] sm:$0xff]   ;;  %v359_v4 = vld [vmem:[#allocation5 + $0x10] sm:$0xff]   ;;  %v362_v5 = vld [vmem:[#allocation7 + $0x8] sm:$0xff]   ;;  %vm107_vm1 = vcmask 523264  }
  0x3b   :  { %327 = vmatprep.subr.bf16.mxu1 %v470_v0  ;;  %343 = vmatprep.mubr.msk.bf16.mxu1 %vm471_vm0, %v470_v0  ;;  %v360_v6 = vld [vmem:[#allocation5 + $0x18] sm:$0xff]   ;;  %v363_v8 = vld [vmem:[#allocation7 + $0x10] sm:$0xff]   ;;  %v365_v11 = vld [vmem:[#allocation7 + $0x20] sm:$0xff]  }
  0x3c   :  { %316 = vmatpush3.bf16.msra.mxu0 %v357_v1  ;;  %328 = vmatpush3.bf16.msra.mxu1 %v361_v3  ;;  %v66_v7 = vld [vmem:[#allocation2] sm:$0xff]  ;;  %v366_v12 = vld [vmem:[#allocation7 + $0x28] sm:$0xff]   ;;  %v367_v13 = vld [vmem:[#allocation7 + $0x30] sm:$0xff]  }
  0x3d   :  { %317 = vmatprep.subr.bf16.mxu0 %v470_v0  ;;  %329 = vmatprep.subr.bf16.mxu1 %v470_v0  ;;  %v67_v9 = vpack.c.bf16 %v66_v7, %v66_v7  ;;  %v364_v10 = vld [vmem:[#allocation7 + $0x18] sm:$0xff]  }
  0x3e   :  { %v368_v14 = vld [vmem:[#allocation7 + $0x38] sm:$0xff]  }
  0x3f   :  { %v286_v15 = vld [vmem:[%s580_s3] ss:$0 sm:$0xff] }
  0x40   :  { %318 = vmatpush3.bf16.msra.mxu0 %v358_v2  ;;  %330 = vmatpush3.bf16.msra.mxu1 %v362_v5  ;;  %v264_v23 = vld [vmem:[%s578_s1] sm:$0xff] }
  0x41   :  { %319 = vmatprep.subr.bf16.mxu0 %v470_v0  ;;  %331 = vmatprep.subr.bf16.mxu1 %v470_v0  ;;  %v292_v24 = vld [vmem:[%s582_s5] ss:$0 sm:$0xff]  ;;  %vm265_vm2 = vcmp.ne.f32.partialorder %v264_v23, 0.0 }
  0x44   :  { %320 = vmatpush3.bf16.msra.mxu0 %v359_v4  ;;  %332 = vmatpush3.bf16.msra.mxu1 %v363_v8 }
  0x45   :  { %321 = vmatprep.subr.bf16.mxu0 %v470_v0  ;;  %333 = vmatprep.subr.bf16.mxu1 %v470_v0 }
  0x48   :  { %322 = vmatpush3.bf16.msra.mxu0 %v360_v6  ;;  %334 = vmatpush3.bf16.msra.mxu1 %v364_v10 }
  0x49   :  { %335 = vmatprep.subr.bf16.mxu1 %v470_v0 }
  0x4b   :  { %324 = vmatmul.mubr.msk.bf16.vlgmr.msra.gmra.mrb[0].mxu0 %vm107_vm1, %v67_v9 }
  0x4c   :  { %336 = vmatpush3.bf16.msra.mxu1 %v365_v11 }
  0x4d   :  { %337 = vmatprep.subr.bf16.mxu1 %v470_v0 }
  0x50   :  { %338 = vmatpush3.bf16.msra.mxu1 %v366_v12 }
  0x51   :  { %339 = vmatprep.subr.bf16.mxu1 %v470_v0 }
  0x54   :  { %340 = vmatpush3.bf16.msra.mxu1 %v367_v13 }
  0x55   :  { %341 = vmatprep.subr.bf16.mxu1 %v470_v0 }
  0x58   :  { %342 = vmatpush3.bf16.msra.mxu1 %v368_v14 }
 0x11e   :  { %v145_v16 = vpop.f32.mrb[0].mxu0 }
 0x11f   :  { %v146_v17 = vadd.f32 %v286_v15, %v145_v16  ;;  %v325_v18 = vpop.f32.mrb[1].mxu0 }
 0x120   :  { %v148_v19 = vpop.f32.mrb[2].mxu0 }
 0x121   :  { %v151_v20 = vmax.f32 %v146_v17, 0.0  ;;  %v326_v21 = vpop.f32.mrb[3].mxu0 }
 0x123   :  { %v152_v22 = vpack.c.bf16 %v151_v20, %v151_v20 }
 0x125   :  { %344 = vmatmul.mubr.bf16.vlgmr.msra.gmra.mrb[0].mxu1 %v152_v22 }
 0x1f8   :  { %v258_v25 = vpop.f32.mrb[0].mxu1 }
 0x1f9   :  { %v259_v26 = vadd.f32 %v292_v24, %v258_v25  ;;  %v345_v27 = vpop.f32.mrb[1].mxu1 }
 0x1fa   :  { %v261_v28 = vpop.f32.mrb[2].mxu1 }
 0x1fb   :  { %v266_v29 = vsel %vm265_vm2, %v259_v26, -1e+09  ;;  %v346_v30 = vpop.f32.mrb[3].mxu1 }
 0x1fc   :  { %267 = vst [vmem:[#allocation8] sm:$0xff] %v266_v29 }
 0x1fd   :  { %272 = vsyncadd [#allocation4], 96  ;;  %s472_s3 = smov [#allocation8]  }
 0x1fe   :  { %s273_s17 = sshll.u32 %s472_s3, 4  ;;  %s274_s17 = int_to_ptr.vmem [resolvable:$true] %s273_s17 }
 0x1ff   :  { %s435_s18 = scalar_lea.vmem %s274_s17, 32  ;;  %s439_s19 = scalar_lea.vmem %s274_s17, 128 }
 0x200   :  { %p436_p10 = scmp.ne.s32.totalorder %s274_s17, %s435_s18  ;;  %p440_p11 = scmp.lt.s32.totalorder %s274_s17, %s274_s17 }
 0x201   :  { %p441_p12 = scmp.lt.s32.totalorder %s439_s19, %s435_s18 }
 0x203   :  { %p442_p13 = por %p441_p12, %p440_p11 }
 0x205   :  { %p443_p0 = pnand %p442_p13, %p436_p10 }
 0x207   :  { %446 = shalt.err (!%p443_p0)
}
 0x208   :  { %s447_s20 = scalar_lea.hbm %s583_s6, 32 }
 0x209   :  { %p448_p1 = scmp.ne.s32.totalorder %s583_s6, %s447_s20  ;;  %p451_p2 = scmp.lt.u32.totalorder %s447_s20, %s583_s6 }
 0x20b   :  { %p453_p3 = pnand %p451_p2, %p448_p1 }
 0x20d   :  { %456 = shalt.err (!%p453_p3)
}
 0x20e   :  { %279 = dma.vmem_to_hbm [thread:$0]  %s274_s17, 32, %s583_s6, [#allocation4], %s467_s21, %s467_s21, %s468_s22  }
 0x20f   :  { %461 = dma.done.wait [#allocation4], 128  }
 0x210   :  { %462 = vsyncadd [#allocation4], 4294967168 }
 0x211   :  { %283 = vsyncpa [#allocation3], 1 }
 0x212   :  { %284 = vsyncpa [#allocation6], 1 }
 0x213   :  { %285 = vsyncpa [#allocation4], 1 }

</bundles_post_ra>
